<compile_context>
chip_gen: v5e
topology: v5e:2x2
jax: 0.10.0
libtpu: 0.0.40
codegen_flags: <defaults>
</compile_context>

<pallas_src>
import functools

import jax
import jax.numpy as jnp
from jax.experimental import pallas as pl
from jax.experimental.pallas import tpu as pltpu


def rbf_kernel(x2_ref, x_ref, ct_ref, c2_ref, nbeta_ref, o_ref):
    # x2_ref:    (TB, 1)   precomputed ||x||^2                (float32)
    # x_ref:     (TB, D)   batch tile                         (matmul dtype)
    # ct_ref:    (D,  TN)  -2 * centers^T                     (matmul dtype)
    # c2_ref:    (1,  TN)  precomputed ||c||^2                (float32)
    # nbeta_ref: (1,  TN)  precomputed -softplus(log_beta)    (float32)
    # o_ref:     (TB, TN)  output tile
    #
    # Cross term on the MXU; the -2 factor is folded into ct.
    xc = jnp.dot(x_ref[...], ct_ref[...],
                 preferred_element_type=jnp.float32)             # (TB, TN)

    # ||x - c||^2 = ||x||^2 + ||c||^2 - 2<x,c>; clamp cancellation at 0.
    dist = jnp.maximum(x2_ref[...] + c2_ref[...] + xc, 0.0)       # (TB, TN)

    o_ref[...] = jnp.exp(nbeta_ref[...] * dist).astype(o_ref.dtype)


def _round_up(x, m):
    return ((x + m - 1) // m) * m


@functools.partial(jax.jit,
                   static_argnames=("matmul_dtype", "out_dtype", "tb", "tn"))
def rbf_layer(x, centers, log_beta, *, matmul_dtype=jnp.float32,
              out_dtype=jnp.float32, tb=None, tn=None):
    """Pallas RBF layer.

    x: (B, D), centers: (N, D), log_beta: (N,).
    matmul_dtype: jnp.bfloat16 is the fast path on v6e/v7x (NOTE: the
      ||x||^2+||c||^2-2<x,c> form loses some precision by cancellation in
      bf16; keep f32 for precision-sensitive use).
    out_dtype: bf16 halves the dominant HBM writeback on v5e/v6e.
    """
    B, D = x.shape
    N, Dc = centers.shape
    assert D == Dc

    # --- host-side (grid-invariant) precomputation, all in f32 -------------
    x_f32 = x.astype(jnp.float32)
    centers_f32 = centers.astype(jnp.float32)
    c2 = jnp.sum(centers_f32 * centers_f32, axis=-1)[None, :]          # (1, N)
    neg_beta = -jax.nn.softplus(log_beta.astype(jnp.float32))[None, :]  # (1, N)
    # Fold the -2 into the centers (exact even in bf16: power-of-two scale).
    ct = (-2.0 * centers_f32.T).astype(matmul_dtype)                   # (D, N)
    x2 = jnp.sum(x_f32 * x_f32, axis=-1, keepdims=True)                # (B, 1)
    xm = x_f32.astype(matmul_dtype)                                    # (B, D)

    # --- tile sizes ---------------------------------------------------------
    out_isize = jnp.dtype(out_dtype).itemsize
    sub = 8 if out_isize >= 4 else (16 if out_isize == 2 else 32)

    # N tiling: lane-dense (multiple of 128); VMEM flat in N.
    n128 = _round_up(N, 128)
    if tn is None:
        tn = min(512, n128)
    assert tn % 128 == 0
    Np = _round_up(N, tn)
    nj = Np // tn

    # Batch tiling: big enough to amortize per-step overhead; sublane-packed
    # for the output dtype. If a small problem would collapse to a single
    # grid step, split the batch so both v7x TensorCores get work.
    if tb is None:
        if B > 512:
            tb = 512
        else:
            tb = _round_up(B, sub)
            if nj == 1 and B > sub:
                tb = _round_up(-(-B // 2), sub)
    assert tb % sub == 0
    Bp = _round_up(B, tb)

    # --- padding ------------------------------------------------------------
    if Np != N:
        ct = jnp.pad(ct, ((0, 0), (0, Np - N)))
        c2 = jnp.pad(c2, ((0, 0), (0, Np - N)))
        neg_beta = jnp.pad(neg_beta, ((0, 0), (0, Np - N)))
    if Bp != B:
        xm = jnp.pad(xm, ((0, Bp - B), (0, 0)))
        x2 = jnp.pad(x2, ((0, Bp - B), (0, 0)))

    # --- VMEM budget --------------------------------------------------------
    # The auto-pipeliner double-buffers every input/output regardless of a
    # constant index_map, so count 2x for all operands plus headroom for the
    # f32 (tb, tn) intermediates (xc, dist).
    mm_isize = jnp.dtype(matmul_dtype).itemsize
    est = (2 * tb * D * mm_isize      # x tile
           + 2 * tb * 4               # ||x||^2 tile
           + 2 * D * tn * mm_isize    # centers tile
           + 2 * 2 * tn * 4           # ||c||^2 + neg_beta tiles
           + 2 * tb * tn * out_isize  # output tile
           + 2 * tb * tn * 4          # f32 intermediates headroom
           + (1 << 20))               # slack
    try:
        vmem_cap = pltpu.get_tpu_info().vmem_capacity_bytes
    except Exception:  # conservative fallback if the query is unavailable
        vmem_cap = 64 << 20
    budget = min(int(0.75 * vmem_cap), 96 << 20)   # ~48 MiB on v7x, 96 on v5e/v6e
    vmem_limit = None
    if est > (16 << 20):
        vmem_limit = min(_round_up(est, 1 << 20) + (4 << 20), budget)

    out = pl.pallas_call(
        rbf_kernel,
        out_shape=jax.ShapeDtypeStruct((Bp, Np), out_dtype),
        grid_spec=pltpu.PrefetchScalarGridSpec(
            num_scalar_prefetch=0,
            grid=(Bp // tb, nj),
            in_specs=[
                pl.BlockSpec((tb, 1), lambda i, j: (i, 0)),    # ||x||^2
                pl.BlockSpec((tb, D), lambda i, j: (i, 0)),    # x tile
                pl.BlockSpec((D, tn), lambda i, j: (0, j)),    # -2*centers^T
                pl.BlockSpec((1, tn), lambda i, j: (0, j)),    # ||c||^2
                pl.BlockSpec((1, tn), lambda i, j: (0, j)),    # -softplus(log_beta)
            ],
            out_specs=pl.BlockSpec((tb, tn), lambda i, j: (i, j)),
        ),
        compiler_params=pltpu.CompilerParams(
            dimension_semantics=("parallel", "parallel"),
            vmem_limit_bytes=vmem_limit,
        ),
    )(x2, xm, ct, c2, neg_beta)

    return out[:B, :N]


def rbf_reference(x, centers, log_beta):
    # Pure-JAX reference matching the PyTorch broadcast/reduce formulation.
    diff = x[:, None, :] - centers[None, :, :]               # (B, N, D)
    dist = jnp.sum(diff * diff, axis=-1)                     # (B, N)
    beta = jax.nn.softplus(log_beta)                         # (N,)
    return jnp.exp(-beta[None, :] * dist)


if __name__ == "__main__":
    key = jax.random.PRNGKey(0)

    # Case 1: aligned shapes, f32 matmul (exact path, tight tolerance).
    B, D, N = 8, 32, 128
    kx, kc = jax.random.split(key)
    x = jax.random.normal(kx, (B, D), dtype=jnp.float32)
    centers = jax.random.uniform(kc, (N, D), minval=-1.0, maxval=1.0,
                                 dtype=jnp.float32)
    log_beta = jnp.full((N,), jnp.log(0.1), dtype=jnp.float32)

    out = jax.block_until_ready(rbf_layer(x, centers, log_beta))
    ref = rbf_reference(x, centers, log_beta)
    assert out.shape == (B, N)
    assert jnp.allclose(out, ref, atol=1e-5, rtol=1e-5), (
        float(jnp.max(jnp.abs(out - ref))))

    # Case 2: ragged shapes (exercises B/N padding + output slice).
    B2, D2, N2 = 6, 10, 20
    kx2, kc2 = jax.random.split(kc)
    x2_in = jax.random.normal(kx2, (B2, D2), dtype=jnp.float32)
    centers2 = jax.random.uniform(kc2, (N2, D2), minval=-1.0, maxval=1.0,
                                  dtype=jnp.float32)
    log_beta2 = jnp.full((N2,), jnp.log(0.1), dtype=jnp.float32)

    out2 = jax.block_until_ready(rbf_layer(x2_in, centers2, log_beta2))
    ref2 = rbf_reference(x2_in, centers2, log_beta2)
    assert out2.shape == (B2, N2)
    assert jnp.allclose(out2, ref2, atol=1e-5, rtol=1e-5), (
        float(jnp.max(jnp.abs(out2 - ref2))))

    # Case 3: multiple N grid steps + ragged N (exercises the new N tiling).
    B3, D3, N3 = 20, 16, 260
    kx3, kc3 = jax.random.split(kc2)
    x3 = jax.random.normal(kx3, (B3, D3), dtype=jnp.float32)
    centers3 = jax.random.uniform(kc3, (N3, D3), minval=-1.0, maxval=1.0,
                                  dtype=jnp.float32)
    log_beta3 = jnp.full((N3,), jnp.log(0.1), dtype=jnp.float32)

    out3 = jax.block_until_ready(rbf_layer(x3, centers3, log_beta3, tn=128))
    ref3 = rbf_reference(x3, centers3, log_beta3)
    assert out3.shape == (B3, N3)
    assert jnp.allclose(out3, ref3, atol=1e-5, rtol=1e-5), (
        float(jnp.max(jnp.abs(out3 - ref3))))

    # Case 4: bf16 matmul inputs + bf16 output (v5e/v6e writeback-bound fast
    # path), looser tolerance.
    out4 = jax.block_until_ready(
        rbf_layer(x, centers, log_beta,
                  matmul_dtype=jnp.bfloat16, out_dtype=jnp.bfloat16))
    assert out4.dtype == jnp.bfloat16
    assert jnp.allclose(out4.astype(jnp.float32), ref, atol=2e-2, rtol=2e-2), (
        float(jnp.max(jnp.abs(out4.astype(jnp.float32) - ref))))

    print("KERNEL_OK")
</pallas_src>

<mosaic_0001>
module attributes {stable_mosaic.version = 11 : i64} {
  func.func @rbf_kernel(%arg0: i32, %arg1: i32, %arg2: memref<8x1xf32, #tpu.memory_space<vmem>>, %arg3: memref<8x32xf32, #tpu.memory_space<vmem>>, %arg4: memref<32x128xf32, #tpu.memory_space<vmem>>, %arg5: memref<1x128xf32, #tpu.memory_space<vmem>>, %arg6: memref<1x128xf32, #tpu.memory_space<vmem>>, %arg7: memref<8x128xf32, #tpu.memory_space<vmem>>) attributes {dimension_semantics = [#tpu.dimension_semantics<parallel>, #tpu.dimension_semantics<parallel>], iteration_bounds = array<i64: 1, 1>, scalar_prefetch = 0 : i64, scratch_operands = 0 : i64, tpu.core_type = #tpu.core_type<tc>, window_params = [{transform_indices = @transform_0, window_bounds = array<i64: 8, 1>}, {transform_indices = @transform_1, window_bounds = array<i64: 8, 32>}, {transform_indices = @transform_2, window_bounds = array<i64: 32, 128>}, {transform_indices = @transform_3, window_bounds = array<i64: 1, 128>}, {transform_indices = @transform_4, window_bounds = array<i64: 1, 128>}, {transform_indices = @transform_5, window_bounds = array<i64: 8, 128>}]} {
    %c0 = arith.constant 0 : index
    %c0_0 = arith.constant 0 : index
    %0 = vector.load %arg3[%c0, %c0_0] : memref<8x32xf32, #tpu.memory_space<vmem>>, vector<8x32xf32>
    %c0_1 = arith.constant 0 : index
    %c0_2 = arith.constant 0 : index
    %1 = vector.load %arg4[%c0_1, %c0_2] : memref<32x128xf32, #tpu.memory_space<vmem>>, vector<32x128xf32>
    %cst = arith.constant dense<0.000000e+00> : vector<8x128xf32>
    %2 = tpu.matmul %0, %1, %cst {dimension_numbers = #tpu.dot_dimension_numbers<[1], [0], [0], [1], [0, 0, 1, 1], [], []>} : vector<8x32xf32>, vector<32x128xf32>, vector<8x128xf32> -> vector<8x128xf32>
    %c0_3 = arith.constant 0 : index
    %c0_4 = arith.constant 0 : index
    %3 = vector.load %arg2[%c0_3, %c0_4] : memref<8x1xf32, #tpu.memory_space<vmem>>, vector<8x1xf32>
    %c0_5 = arith.constant 0 : index
    %c0_6 = arith.constant 0 : index
    %4 = vector.load %arg5[%c0_5, %c0_6] : memref<1x128xf32, #tpu.memory_space<vmem>>, vector<1x128xf32>
    %5 = vector.broadcast %3 : vector<8x1xf32> to vector<8x128xf32>
    %6 = vector.broadcast %4 : vector<1x128xf32> to vector<8x128xf32>
    %7 = arith.addf %5, %6 : vector<8x128xf32>
    %8 = arith.addf %7, %2 : vector<8x128xf32>
    %cst_7 = arith.constant 0.000000e+00 : f32
    %9 = vector.broadcast %cst_7 : f32 to vector<8x128xf32>
    %10 = arith.maximumf %8, %9 : vector<8x128xf32>
    %c0_8 = arith.constant 0 : index
    %c0_9 = arith.constant 0 : index
    %11 = vector.load %arg6[%c0_8, %c0_9] : memref<1x128xf32, #tpu.memory_space<vmem>>, vector<1x128xf32>
    %12 = vector.broadcast %11 : vector<1x128xf32> to vector<8x128xf32>
    %13 = arith.mulf %12, %10 : vector<8x128xf32>
    %14 = math.exp %13 : vector<8x128xf32>
    %c0_10 = arith.constant 0 : index
    %c0_11 = arith.constant 0 : index
    %15 = vector.load %arg7[%c0_10, %c0_11] : memref<8x128xf32, #tpu.memory_space<vmem>>, vector<8x128xf32>
    tpu.vector_store %arg7[%c0_10, %c0_11], %14 {strides = array<i32>} : memref<8x128xf32, #tpu.memory_space<vmem>>, vector<8x128xf32>,
    return
  }
  func.func @transform_0(%arg0: i32, %arg1: i32) -> (i32, i32) {
    %c0_i32 = arith.constant 0 : i32
    %c0_i32_0 = arith.constant 0 : i32
    return %arg0, %c0_i32 : i32, i32
  }
  func.func @transform_1(%arg0: i32, %arg1: i32) -> (i32, i32) {
    %c0_i32 = arith.constant 0 : i32
    %c0_i32_0 = arith.constant 0 : i32
    return %arg0, %c0_i32 : i32, i32
  }
  func.func @transform_2(%arg0: i32, %arg1: i32) -> (i32, i32) {
    %c0_i32 = arith.constant 0 : i32
    %c0_i32_0 = arith.constant 0 : i32
    return %c0_i32, %arg1 : i32, i32
  }
  func.func @transform_3(%arg0: i32, %arg1: i32) -> (i32, i32) {
    %c0_i32 = arith.constant 0 : i32
    %c0_i32_0 = arith.constant 0 : i32
    return %c0_i32, %arg1 : i32, i32
  }
  func.func @transform_4(%arg0: i32, %arg1: i32) -> (i32, i32) {
    %c0_i32 = arith.constant 0 : i32
    %c0_i32_0 = arith.constant 0 : i32
    return %c0_i32, %arg1 : i32, i32
  }
  func.func @transform_5(%arg0: i32, %arg1: i32) -> (i32, i32) {
    %c0_i32 = arith.constant 0 : i32
    return %arg0, %arg1 : i32, i32
  }
}

</mosaic_0001>

<bundles_post_ra>
// kernel: rbf_layer.1
= control target key start
LH: loop header
LB: loop body
LE: loop exit
PB: predicated region body
PF: predicated region fallthrough
CT: control target
= control target key end

     0   :  { %v121_v2 = vmov 0   ;;  %s180_s0 = inlined_call_operand.vmem [shape: f32[8,1], index: 0, kind: input, shape index: {}]   ;;  %s181_s1 = inlined_call_operand.vmem [shape: f32[8,32], index: 1, kind: input, shape index: {}]   ;;  %s182_s2 = inlined_call_operand.vmem [shape: f32[32,128], index: 2, kind: input, shape index: {}]   ;;  %s183_s3 = inlined_call_operand.vmem [shape: f32[1,128], index: 3, kind: input, shape index: {}]   ;;  %s184_s4 = inlined_call_operand.vmem [shape: f32[1,128], index: 4, kind: input, shape index: {}]   ;;  %s185_s5 = inlined_call_operand.hbm [shape: f32[8,128], index: 5, kind: output, shape index: {}]  }
   0x1   :  { %v25_v0 = vld [vmem:[%s182_s2 + $0x18] sm:$0xff]  ;;  %v24_v1 = vld [vmem:[%s182_s2 + $0x10] sm:$0xff]  ;;  %90 = vset.pattern.permute.xlu0 %v121_v2  ;;  %v50_v3 = vld [vmem:[%s180_s0] sm:$0xff] }
   0x2   :  { %42 = vmatpush.msra.mxu0 %v25_v0  ;;  %v23_v4 = vld [vmem:[%s182_s2 + $0x8] sm:$0xff]  ;;  %54 = vperm.xlu0 %90, %v50_v3  }
   0x4   :  { %43 = vmatpush.msra.mxu0 %v24_v1 }
   0x5   :  { %10 = vsyncpa [#allocation3], 0  ;;  %v22_v5 = vld [vmem:[%s182_s2] sm:$0xff]  ;;  %vm26_vm0 = vcmask 261120   ;;  %s78_s10 = sshll.u32 %s185_s5, 4  ;;  %s79_s10 = int_to_ptr.hbm [resolvable:$true] %s78_s10 }
   0x6   :  { %44 = vmatpush.msra.mxu0 %v23_v4  ;;  %v21_v6 = vld [vmem:[%s181_s1] sm:$0xff]  ;;  %s122_s1 = smov [#allocation2]  }
   0x7   :  { %v91_v7 = vld [vmem:[%s183_s3] ss:$0 sm:$0xff]  ;;  %s76_s2 = sshll.u32 %s122_s1, 4  ;;  %s77_s2 = int_to_ptr.vmem [resolvable:$true] %s76_s2 }
   0x8   :  { %45 = vmatpush.msra.mxu0 %v22_v5  ;;  %v92_v12 = vld [vmem:[%s184_s4] ss:$0 sm:$0xff] }
   0x9   :  { %87 = vmatmul.msk.f32.vlgmr.msra.gmra.mxu0 %vm26_vm0, %v21_v6 }
  0x74   :  { %v55_v8 = vpop.permute.xlu0 %54 }
  0x75   :  { %v60_v9 = vadd.f32 %v91_v7, %v55_v8 }
  0x86   :  { %v47_v10 = vpop.f32.mrf.mxu0 }
  0x87   :  { %v61_v11 = vadd.f32 %v60_v9, %v47_v10 }
  0x89   :  { %v62_v13 = vmax.f32 %v61_v11, 0.0 }
  0x8b   :  { %v67_v14 = vmul.f32 %v92_v12, %v62_v13 }
  0x8d   :  { %v68_v15 = vmul.f32 1.442695, %v67_v14 }
  0x8f   :  { %93 = vpow2.f32 %v68_v15 }
  0x95   :  { %v94_v16 = vpop.eup %93 }
  0x96   :  { %70 = vst [vmem:[#allocation2] sm:$0xff] %v94_v16 }
  0x97   :  { %81 = dma.vmem_to_hbm [thread:$0]  %s77_s2, 128, %s79_s10, [#allocation3]  }
  0x98   :  { %119 = dma.done.wait [#allocation3], 128  }
  0x99   :  { %120 = vsyncadd [#allocation3], 4294967168 }
  0x9a   :  { %86 = vsyncpa [#allocation3], 1 }

</bundles_post_ra>
